<compile_context>
chip_gen: v6e
topology: v6e:2x2x1
jax: 0.10.0
libtpu: 0.0.40
codegen_flags: <defaults>
</compile_context>

<pallas_src>
import functools

import jax
import jax.numpy as jnp
from jax.experimental import pallas as pl
from jax.experimental.pallas import tpu as pltpu


def _round_up(x: int, m: int) -> int:
    return (x + m - 1) // m * m


def _vmem_limit_bytes() -> int:
    """Generation-aware scoped-VMEM limit (leaves headroom for compiler scratch)."""
    try:
        cap = int(pltpu.get_tpu_info().vmem_capacity_bytes)
    except Exception:
        cap = 0
    if cap <= 0:
        cap = 64 * 1024 * 1024  # conservative default: fits every generation
    return int(cap * 0.8)       # ~51 MB on v7x, ~107 MB on v5e/v6e


def _make_kernel(n: int, c: int, squared_pred: bool, has_pad: bool):
    def kernel(logits_ref, target_ref, out_ref):
        # Output block is resident in VMEM across the inner ("arbitrary") grid
        # axis: zero it on the first inner step, accumulate afterwards, and it
        # is written back to HBM only once per outer index.
        @pl.when(pl.program_id(1) == 0)
        def _init():
            out_ref[...] = jnp.zeros_like(out_ref)

        x = logits_ref[...].astype(jnp.float32)      # (N, C, RT, 128)
        t = target_ref[...].astype(jnp.int32)        # (N, RT, 128)

        # Softmax over the class axis.  C is a *major* axis in this layout, so
        # max/sum over classes are elementwise VPU ops across dense slabs.
        m = jnp.max(x, axis=1, keepdims=True)        # (N, 1, RT, 128)
        z = x - m
        ez = jnp.exp(z)
        se = jnp.sum(ez, axis=1, keepdims=True)      # (N, 1, RT, 128)
        # approx=True would move the divide to the EUP, but exp already owns
        # that slot here; keep the exact divide.
        inv_se = pl.reciprocal(se[:, 0], approx=False)   # (N, RT, 128)
        log_se = jnp.log(se[:, 0])                       # (N, RT, 128)

        valid = (t >= 0) if has_pad else None        # sentinel -1 marks padding

        def psum(v):
            # (N, RT, 128) -> (N, 1): reduce rows first (vreg adds), lanes last.
            return jnp.sum(jnp.sum(v, axis=1), axis=-1, keepdims=True)

        inters, preds, gts, cezs = [], [], [], []
        for ci in range(c):                          # unrolled; no (N,C,TP) iota
            z_c = z[:, ci]                           # (N, RT, 128)
            p_c = ez[:, ci] * inv_se                 # softmax prob of class ci
            mask_c = t == ci                         # padded pixels never match
            pv = p_c * p_c if squared_pred else p_c
            if valid is not None:
                pv = jnp.where(valid, pv, 0.0)
            inters.append(psum(jnp.where(mask_c, p_c, 0.0)))
            preds.append(psum(pv))
            gts.append(psum(mask_c.astype(jnp.float32)))
            cezs.append(psum(jnp.where(mask_c, z_c, 0.0)))

        inter = jnp.concatenate(inters, axis=1)      # (N, C)
        pred = jnp.concatenate(preds, axis=1)
        gt = jnp.concatenate(gts, axis=1)
        cez = jnp.concatenate(cezs, axis=1)

        # CE = -(sum selected z - sum log(se)); logp is never materialized.
        logse_src = jnp.where(valid, log_se, 0.0) if valid is not None else log_se
        logse = jnp.broadcast_to(psum(logse_src), (n, c))

        out_ref[0, 0, :, :] += inter
        out_ref[0, 1, :, :] += pred
        out_ref[0, 2, :, :] += gt
        out_ref[0, 3, :, :] += cez
        out_ref[0, 4, :, :] += logse

    return kernel


@functools.partial(jax.jit, static_argnames=(
    "include_background", "squared_pred", "lambda_dice", "lambda_ce",
    "smooth", "max_rows_tile"))
def dice_ce_loss(logits_nchw, target_nhw, *, include_background: bool,
                 squared_pred: bool, lambda_dice: float = 1.0,
                 lambda_ce: float = 1.0, smooth: float = 1e-5,
                 max_rows_tile: int = 1024):
    n, c, h, w = logits_nchw.shape
    if (not include_background) and c == 1:
        raise ValueError("include_background=False with a single channel would "
                         "produce an empty dice term (NaN mean).")
    p = h * w
    rows = pl.cdiv(p, 128)                       # pixel rows of 128 lanes

    # ---- generation-aware tile sizing -------------------------------------
    vmem_limit = _vmem_limit_bytes()
    tgt_dtype = jnp.int8 if c <= 127 else jnp.int32
    logit_bytes = jnp.dtype(logits_nchw.dtype).itemsize
    tgt_bytes = jnp.dtype(tgt_dtype).itemsize
    # Per row-of-128-pixels: double-buffered logits + targets, plus ~6 full
    # f32 temporaries (x, z, ez, per-class slabs, headroom) for spill slabs.
    per_row = n * 128 * (2 * c * logit_bytes + 2 * tgt_bytes + 6 * c * 4)
    budget_rows = max(8, (int(vmem_limit * 0.6) // per_row) // 8 * 8)
    cap = min(budget_rows, max(8, (max_rows_tile // 8) * 8))

    num_tiles = pl.cdiv(rows, cap)
    if num_tiles > 1 and num_tiles % 2:          # even tile count -> 2-way split
        num_tiles += 1
    rows_tile = _round_up(pl.cdiv(rows, num_tiles), 8)
    rows_pad = num_tiles * rows_tile
    p_pad = rows_pad * 128
    has_pad = p_pad != p
    n_outer = 2 if (num_tiles % 2 == 0 and num_tiles >= 2) else 1
    n_inner = num_tiles // n_outer

    # ---- pixel-dense re-layout (class axis is major) ----------------------
    x = logits_nchw.reshape(n, c, p)             # keep storage dtype over HBM
    if has_pad:
        x = jnp.pad(x, ((0, 0), (0, 0), (0, p_pad - p)))
    x = x.reshape(n, c, rows_pad, 128)

    t = target_nhw.reshape(n, p).astype(tgt_dtype)
    if has_pad:
        t = jnp.pad(t, ((0, 0), (0, p_pad - p)), constant_values=-1)
    t = t.reshape(n, rows_pad, 128)

    kernel = _make_kernel(n, c, squared_pred, has_pad)

    cost = pl.CostEstimate(
        flops=int(12 * n * c * p_pad),
        transcendentals=int(n * c * p_pad + 2 * n * p_pad),
        bytes_accessed=int(x.size * logit_bytes + t.size * tgt_bytes
                           + n_outer * 5 * n * c * 4))

    stats = pl.pallas_call(
        kernel,
        out_shape=jax.ShapeDtypeStruct((n_outer, 5, n, c), jnp.float32),
        grid_spec=pltpu.PrefetchScalarGridSpec(
            num_scalar_prefetch=0,
            grid=(n_outer, n_inner),
            in_specs=[
                pl.BlockSpec((n, c, rows_tile, 128),
                             lambda o, i: (0, 0, o * n_inner + i, 0)),
                pl.BlockSpec((n, rows_tile, 128),
                             lambda o, i: (0, o * n_inner + i, 0)),
            ],
            out_specs=pl.BlockSpec((1, 5, n, c), lambda o, i: (o, 0, 0, 0)),
        ),
        compiler_params=pltpu.CompilerParams(
            dimension_semantics=("parallel", "arbitrary"),
            vmem_limit_bytes=vmem_limit),
        cost_estimate=cost,
    )(x, t)

    # ---- tiny finalisation in plain JAX (inside the same jit) -------------
    inter = jnp.sum(stats[:, 0], axis=0)         # (N, C)
    pred = jnp.sum(stats[:, 1], axis=0)          # (N, C)
    gt = jnp.sum(stats[:, 2], axis=0)            # (N, C)
    cez_total = jnp.sum(stats[:, 3])             # scalar: sum of selected z
    logse_total = jnp.sum(stats[:, 4, :, 0])     # scalar: sum of log(sum exp)

    ce_loss = (logse_total - cez_total) / float(n * p)
    dice = 1.0 - (2.0 * inter + smooth) / (pred + gt + smooth)
    if not include_background:
        dice = dice[:, 1:]
    dice_loss = jnp.mean(dice)
    return lambda_dice * dice_loss + lambda_ce * ce_loss


def _reference(logits_nchw, target_nhw, *, include_background, squared_pred,
               lambda_dice=1.0, lambda_ce=1.0, smooth=1e-5):
    n, c, h, w = logits_nchw.shape
    x = logits_nchw.reshape(n, c, h * w).astype(jnp.float32)
    t = target_nhw.reshape(n, h * w).astype(jnp.int32)
    logp = jax.nn.log_softmax(x, axis=1)
    probs = jnp.exp(logp)
    g = jax.nn.one_hot(t, c, axis=1, dtype=jnp.float32)     # (N, C, P)
    ce = -jnp.mean(jnp.sum(g * logp, axis=1))
    inter = jnp.sum(probs * g, axis=2)
    pred = jnp.sum(probs * probs, axis=2) if squared_pred else jnp.sum(probs, axis=2)
    gt = jnp.sum(g, axis=2)
    dice = 1.0 - (2.0 * inter + smooth) / (pred + gt + smooth)
    if not include_background:
        dice = dice[:, 1:]
    return lambda_dice * jnp.mean(dice) + lambda_ce * ce


if __name__ == "__main__":
    key = jax.random.PRNGKey(0)
    ks = jax.random.split(key, 6)

    cfg = dict(include_background=False, squared_pred=True,
               lambda_dice=1.0, lambda_ce=1.0)

    # 1) f32 logits, small spatial (P=256 -> padded to one 8x128 tile):
    #    exercises the padding/validity-mask path.
    N, C, H, W = 2, 4, 16, 16
    logits = jax.random.normal(ks[0], (N, C, H, W), dtype=jnp.float32)
    target = jax.random.randint(ks[1], (N, H, W), 0, C, dtype=jnp.int32)
    out = jax.block_until_ready(dice_ce_loss(logits, target, **cfg))
    ref = jax.block_until_ready(_reference(logits, target, **cfg))
    assert jnp.isfinite(out), "non-finite loss (case 1)"
    assert jnp.allclose(out, ref, rtol=1e-5, atol=1e-5), (out, ref)

    # 2) bf16 logits + int8 targets over HBM, exact tile fit (P=1024, 1 tile).
    N, C, H, W = 2, 4, 32, 32
    logits2 = jax.random.normal(ks[2], (N, C, H, W), dtype=jnp.bfloat16)
    target2 = jax.random.randint(ks[3], (N, H, W), 0, C, dtype=jnp.int32)
    out2 = jax.block_until_ready(dice_ce_loss(logits2, target2, **cfg))
    ref2 = jax.block_until_ready(_reference(logits2, target2, **cfg))
    assert jnp.isfinite(out2), "non-finite loss (case 2)"
    assert jnp.allclose(out2, ref2, rtol=1e-4, atol=2e-4), (out2, ref2)

    # 3) bf16, odd class count, ragged spatial (P=4032 -> padded), small tile
    #    cap to force a (2, 2) grid: exercises the parallel outer split and
    #    the VMEM-resident accumulator across the inner "arbitrary" axis.
    cfg3 = dict(include_background=True, squared_pred=True,
                lambda_dice=1.0, lambda_ce=1.0)
    N3, C3, H3, W3 = 2, 3, 64, 63
    logits3 = jax.random.normal(ks[4], (N3, C3, H3, W3), dtype=jnp.bfloat16)
    target3 = jax.random.randint(ks[5], (N3, H3, W3), 0, C3, dtype=jnp.int32)
    out3 = jax.block_until_ready(
        dice_ce_loss(logits3, target3, max_rows_tile=8, **cfg3))
    ref3 = jax.block_until_ready(_reference(logits3, target3, **cfg3))
    assert jnp.isfinite(out3), "non-finite loss (case 3)"
    assert jnp.allclose(out3, ref3, rtol=1e-4, atol=2e-4), (out3, ref3)

    print("KERNEL_OK")
</pallas_src>

<mosaic_0001>
module attributes {stable_mosaic.version = 11 : i64} {
  func.func @kernel(%arg0: i32, %arg1: i32, %arg2: memref<2x4x8x128xf32, #tpu.memory_space<vmem>>, %arg3: memref<2x8x128xi8, #tpu.memory_space<vmem>>, %arg4: memref<1x5x2x4xf32, #tpu.memory_space<vmem>>) attributes {dimension_semantics = [#tpu.dimension_semantics<parallel>, #tpu.dimension_semantics<arbitrary>], iteration_bounds = array<i64: 1, 1>, scalar_prefetch = 0 : i64, scratch_operands = 0 : i64, tpu.core_type = #tpu.core_type<tc>, window_params = [{transform_indices = @transform_0, window_bounds = array<i64: 2, 4, 8, 128>}, {transform_indices = @transform_1, window_bounds = array<i64: 2, 8, 128>}, {transform_indices = @transform_2, window_bounds = array<i64: 1, 5, 2, 4>}]} {
    %c0_i32 = arith.constant 0 : i32
    %0 = arith.cmpi eq, %arg1, %c0_i32 : i32
    %1 = arith.extui %0 : i1 to i32
    %c0_i32_0 = arith.constant 0 : i32
    %2 = arith.cmpi ne, %1, %c0_i32_0 : i32
    scf.if %2 {
      %cst_93 = arith.constant 0.000000e+00 : f32
      %172 = vector.broadcast %cst_93 : f32 to vector<1x5x2x4xf32>
      %c0_94 = arith.constant 0 : index
      %c0_95 = arith.constant 0 : index
      %c0_96 = arith.constant 0 : index
      %c0_97 = arith.constant 0 : index
      %173 = vector.load %arg4[%c0_94, %c0_95, %c0_96, %c0_97] : memref<1x5x2x4xf32, #tpu.memory_space<vmem>>, vector<1x5x2x4xf32>
      tpu.vector_store %arg4[%c0_94, %c0_95, %c0_96, %c0_97], %172 {strides = array<i32>} : memref<1x5x2x4xf32, #tpu.memory_space<vmem>>, vector<1x5x2x4xf32>,
    } else {
    }
    %c0 = arith.constant 0 : index
    %c0_1 = arith.constant 0 : index
    %c0_2 = arith.constant 0 : index
    %c0_3 = arith.constant 0 : index
    %3 = vector.load %arg2[%c0, %c0_1, %c0_2, %c0_3] : memref<2x4x8x128xf32, #tpu.memory_space<vmem>>, vector<2x4x8x128xf32>
    %c0_4 = arith.constant 0 : index
    %c0_5 = arith.constant 0 : index
    %c0_6 = arith.constant 0 : index
    %4 = vector.load %arg3[%c0_4, %c0_5, %c0_6] : memref<2x8x128xi8, #tpu.memory_space<vmem>>, vector<2x8x128xi8>
    %5 = arith.extsi %4 : vector<2x8x128xi8> to vector<2x8x128xi32>
    %cst = arith.constant dense<0xFF800000> : vector<2x8x128xf32>
    %6 = vector.multi_reduction <maximumf>, %3, %cst [1] : vector<2x4x8x128xf32> to vector<2x8x128xf32>
    %7 = vector.shape_cast %6 : vector<2x8x128xf32> to vector<2x1x8x128xf32>
    %8 = vector.broadcast %7 : vector<2x1x8x128xf32> to vector<2x4x8x128xf32>
    %9 = arith.subf %3, %8 : vector<2x4x8x128xf32>
    %10 = math.exp %9 : vector<2x4x8x128xf32>
    %cst_7 = arith.constant dense<0.000000e+00> : vector<2x8x128xf32>
    %11 = vector.multi_reduction <add>, %10, %cst_7 [1] : vector<2x4x8x128xf32> to vector<2x8x128xf32>
    %12 = vector.shape_cast %11 : vector<2x8x128xf32> to vector<2x1x8x128xf32>
    %13 = vector.shape_cast %12 : vector<2x1x8x128xf32> to vector<2x8x128xf32>
    %14 = tpu.reciprocal %13 : vector<2x8x128xf32> -> vector<2x8x128xf32>
    %15 = vector.shape_cast %12 : vector<2x1x8x128xf32> to vector<2x8x128xf32>
    %16 = math.log %15 : vector<2x8x128xf32>
    %c0_i32_8 = arith.constant 0 : i32
    %17 = vector.broadcast %c0_i32_8 : i32 to vector<2x8x128xi32>
    %18 = arith.cmpi sge, %5, %17 : vector<2x8x128xi32>
    %19 = vector.extract_strided_slice %9 {offsets = [0, 0, 0, 0], sizes = [2, 1, 8, 128], strides = [1, 1, 1, 1]} : vector<2x4x8x128xf32> to vector<2x1x8x128xf32>
    %20 = vector.shape_cast %19 : vector<2x1x8x128xf32> to vector<2x8x128xf32>
    %21 = vector.extract_strided_slice %10 {offsets = [0, 0, 0, 0], sizes = [2, 1, 8, 128], strides = [1, 1, 1, 1]} : vector<2x4x8x128xf32> to vector<2x1x8x128xf32>
    %22 = vector.shape_cast %21 : vector<2x1x8x128xf32> to vector<2x8x128xf32>
    %23 = arith.mulf %22, %14 : vector<2x8x128xf32>
    %c0_i32_9 = arith.constant 0 : i32
    %24 = vector.broadcast %c0_i32_9 : i32 to vector<2x8x128xi32>
    %25 = arith.cmpi eq, %5, %24 : vector<2x8x128xi32>
    %26 = arith.mulf %23, %23 : vector<2x8x128xf32>
    %cst_10 = arith.constant 0.000000e+00 : f32
    %27 = vector.broadcast %cst_10 : f32 to vector<2x8x128xf32>
    %28 = arith.select %18, %26, %27 : vector<2x8x128xi1>, vector<2x8x128xf32>
    %cst_11 = arith.constant 0.000000e+00 : f32
    %29 = vector.broadcast %cst_11 : f32 to vector<2x8x128xf32>
    %30 = arith.select %25, %23, %29 : vector<2x8x128xi1>, vector<2x8x128xf32>
    %cst_12 = arith.constant dense<0.000000e+00> : vector<2x128xf32>
    %31 = vector.multi_reduction <add>, %30, %cst_12 [1] : vector<2x8x128xf32> to vector<2x128xf32>
    %cst_13 = arith.constant dense<0.000000e+00> : vector<2xf32>
    %32 = vector.multi_reduction <add>, %31, %cst_13 [1] : vector<2x128xf32> to vector<2xf32>
    %33 = vector.shape_cast %32 : vector<2xf32> to vector<2x1xf32>
    %cst_14 = arith.constant dense<0.000000e+00> : vector<2x128xf32>
    %34 = vector.multi_reduction <add>, %28, %cst_14 [1] : vector<2x8x128xf32> to vector<2x128xf32>
    %cst_15 = arith.constant dense<0.000000e+00> : vector<2xf32>
    %35 = vector.multi_reduction <add>, %34, %cst_15 [1] : vector<2x128xf32> to vector<2xf32>
    %36 = vector.shape_cast %35 : vector<2xf32> to vector<2x1xf32>
    %37 = arith.extui %25 : vector<2x8x128xi1> to vector<2x8x128xi32>
    %38 = arith.sitofp %37 : vector<2x8x128xi32> to vector<2x8x128xf32>
    %cst_16 = arith.constant dense<0.000000e+00> : vector<2x128xf32>
    %39 = vector.multi_reduction <add>, %38, %cst_16 [1] : vector<2x8x128xf32> to vector<2x128xf32>
    %cst_17 = arith.constant dense<0.000000e+00> : vector<2xf32>
    %40 = vector.multi_reduction <add>, %39, %cst_17 [1] : vector<2x128xf32> to vector<2xf32>
    %41 = vector.shape_cast %40 : vector<2xf32> to vector<2x1xf32>
    %cst_18 = arith.constant 0.000000e+00 : f32
    %42 = vector.broadcast %cst_18 : f32 to vector<2x8x128xf32>
    %43 = arith.select %25, %20, %42 : vector<2x8x128xi1>, vector<2x8x128xf32>
    %cst_19 = arith.constant dense<0.000000e+00> : vector<2x128xf32>
    %44 = vector.multi_reduction <add>, %43, %cst_19 [1] : vector<2x8x128xf32> to vector<2x128xf32>
    %cst_20 = arith.constant dense<0.000000e+00> : vector<2xf32>
    %45 = vector.multi_reduction <add>, %44, %cst_20 [1] : vector<2x128xf32> to vector<2xf32>
    %46 = vector.shape_cast %45 : vector<2xf32> to vector<2x1xf32>
    %47 = vector.extract_strided_slice %9 {offsets = [0, 1, 0, 0], sizes = [2, 1, 8, 128], strides = [1, 1, 1, 1]} : vector<2x4x8x128xf32> to vector<2x1x8x128xf32>
    %48 = vector.shape_cast %47 : vector<2x1x8x128xf32> to vector<2x8x128xf32>
    %49 = vector.extract_strided_slice %10 {offsets = [0, 1, 0, 0], sizes = [2, 1, 8, 128], strides = [1, 1, 1, 1]} : vector<2x4x8x128xf32> to vector<2x1x8x128xf32>
    %50 = vector.shape_cast %49 : vector<2x1x8x128xf32> to vector<2x8x128xf32>
    %51 = arith.mulf %50, %14 : vector<2x8x128xf32>
    %c1_i32 = arith.constant 1 : i32
    %52 = vector.broadcast %c1_i32 : i32 to vector<2x8x128xi32>
    %53 = arith.cmpi eq, %5, %52 : vector<2x8x128xi32>
    %54 = arith.mulf %51, %51 : vector<2x8x128xf32>
    %cst_21 = arith.constant 0.000000e+00 : f32
    %55 = vector.broadcast %cst_21 : f32 to vector<2x8x128xf32>
    %56 = arith.select %18, %54, %55 : vector<2x8x128xi1>, vector<2x8x128xf32>
    %cst_22 = arith.constant 0.000000e+00 : f32
    %57 = vector.broadcast %cst_22 : f32 to vector<2x8x128xf32>
    %58 = arith.select %53, %51, %57 : vector<2x8x128xi1>, vector<2x8x128xf32>
    %cst_23 = arith.constant dense<0.000000e+00> : vector<2x128xf32>
    %59 = vector.multi_reduction <add>, %58, %cst_23 [1] : vector<2x8x128xf32> to vector<2x128xf32>
    %cst_24 = arith.constant dense<0.000000e+00> : vector<2xf32>
    %60 = vector.multi_reduction <add>, %59, %cst_24 [1] : vector<2x128xf32> to vector<2xf32>
    %61 = vector.shape_cast %60 : vector<2xf32> to vector<2x1xf32>
    %cst_25 = arith.constant dense<0.000000e+00> : vector<2x128xf32>
    %62 = vector.multi_reduction <add>, %56, %cst_25 [1] : vector<2x8x128xf32> to vector<2x128xf32>
    %cst_26 = arith.constant dense<0.000000e+00> : vector<2xf32>
    %63 = vector.multi_reduction <add>, %62, %cst_26 [1] : vector<2x128xf32> to vector<2xf32>
    %64 = vector.shape_cast %63 : vector<2xf32> to vector<2x1xf32>
    %65 = arith.extui %53 : vector<2x8x128xi1> to vector<2x8x128xi32>
    %66 = arith.sitofp %65 : vector<2x8x128xi32> to vector<2x8x128xf32>
    %cst_27 = arith.constant dense<0.000000e+00> : vector<2x128xf32>
    %67 = vector.multi_reduction <add>, %66, %cst_27 [1] : vector<2x8x128xf32> to vector<2x128xf32>
    %cst_28 = arith.constant dense<0.000000e+00> : vector<2xf32>
    %68 = vector.multi_reduction <add>, %67, %cst_28 [1] : vector<2x128xf32> to vector<2xf32>
    %69 = vector.shape_cast %68 : vector<2xf32> to vector<2x1xf32>
    %cst_29 = arith.constant 0.000000e+00 : f32
    %70 = vector.broadcast %cst_29 : f32 to vector<2x8x128xf32>
    %71 = arith.select %53, %48, %70 : vector<2x8x128xi1>, vector<2x8x128xf32>
    %cst_30 = arith.constant dense<0.000000e+00> : vector<2x128xf32>
    %72 = vector.multi_reduction <add>, %71, %cst_30 [1] : vector<2x8x128xf32> to vector<2x128xf32>
    %cst_31 = arith.constant dense<0.000000e+00> : vector<2xf32>
    %73 = vector.multi_reduction <add>, %72, %cst_31 [1] : vector<2x128xf32> to vector<2xf32>
    %74 = vector.shape_cast %73 : vector<2xf32> to vector<2x1xf32>
    %75 = vector.extract_strided_slice %9 {offsets = [0, 2, 0, 0], sizes = [2, 1, 8, 128], strides = [1, 1, 1, 1]} : vector<2x4x8x128xf32> to vector<2x1x8x128xf32>
    %76 = vector.shape_cast %75 : vector<2x1x8x128xf32> to vector<2x8x128xf32>
    %77 = vector.extract_strided_slice %10 {offsets = [0, 2, 0, 0], sizes = [2, 1, 8, 128], strides = [1, 1, 1, 1]} : vector<2x4x8x128xf32> to vector<2x1x8x128xf32>
    %78 = vector.shape_cast %77 : vector<2x1x8x128xf32> to vector<2x8x128xf32>
    %79 = arith.mulf %78, %14 : vector<2x8x128xf32>
    %c2_i32 = arith.constant 2 : i32
    %80 = vector.broadcast %c2_i32 : i32 to vector<2x8x128xi32>
    %81 = arith.cmpi eq, %5, %80 : vector<2x8x128xi32>
    %82 = arith.mulf %79, %79 : vector<2x8x128xf32>
    %cst_32 = arith.constant 0.000000e+00 : f32
    %83 = vector.broadcast %cst_32 : f32 to vector<2x8x128xf32>
    %84 = arith.select %18, %82, %83 : vector<2x8x128xi1>, vector<2x8x128xf32>
    %cst_33 = arith.constant 0.000000e+00 : f32
    %85 = vector.broadcast %cst_33 : f32 to vector<2x8x128xf32>
    %86 = arith.select %81, %79, %85 : vector<2x8x128xi1>, vector<2x8x128xf32>
    %cst_34 = arith.constant dense<0.000000e+00> : vector<2x128xf32>
    %87 = vector.multi_reduction <add>, %86, %cst_34 [1] : vector<2x8x128xf32> to vector<2x128xf32>
    %cst_35 = arith.constant dense<0.000000e+00> : vector<2xf32>
    %88 = vector.multi_reduction <add>, %87, %cst_35 [1] : vector<2x128xf32> to vector<2xf32>
    %89 = vector.shape_cast %88 : vector<2xf32> to vector<2x1xf32>
    %cst_36 = arith.constant dense<0.000000e+00> : vector<2x128xf32>
    %90 = vector.multi_reduction <add>, %84, %cst_36 [1] : vector<2x8x128xf32> to vector<2x128xf32>
    %cst_37 = arith.constant dense<0.000000e+00> : vector<2xf32>
    %91 = vector.multi_reduction <add>, %90, %cst_37 [1] : vector<2x128xf32> to vector<2xf32>
    %92 = vector.shape_cast %91 : vector<2xf32> to vector<2x1xf32>
    %93 = arith.extui %81 : vector<2x8x128xi1> to vector<2x8x128xi32>
    %94 = arith.sitofp %93 : vector<2x8x128xi32> to vector<2x8x128xf32>
    %cst_38 = arith.constant dense<0.000000e+00> : vector<2x128xf32>
    %95 = vector.multi_reduction <add>, %94, %cst_38 [1] : vector<2x8x128xf32> to vector<2x128xf32>
    %cst_39 = arith.constant dense<0.000000e+00> : vector<2xf32>
    %96 = vector.multi_reduction <add>, %95, %cst_39 [1] : vector<2x128xf32> to vector<2xf32>
    %97 = vector.shape_cast %96 : vector<2xf32> to vector<2x1xf32>
    %cst_40 = arith.constant 0.000000e+00 : f32
    %98 = vector.broadcast %cst_40 : f32 to vector<2x8x128xf32>
    %99 = arith.select %81, %76, %98 : vector<2x8x128xi1>, vector<2x8x128xf32>
    %cst_41 = arith.constant dense<0.000000e+00> : vector<2x128xf32>
    %100 = vector.multi_reduction <add>, %99, %cst_41 [1] : vector<2x8x128xf32> to vector<2x128xf32>
    %cst_42 = arith.constant dense<0.000000e+00> : vector<2xf32>
    %101 = vector.multi_reduction <add>, %100, %cst_42 [1] : vector<2x128xf32> to vector<2xf32>
    %102 = vector.shape_cast %101 : vector<2xf32> to vector<2x1xf32>
    %103 = vector.extract_strided_slice %9 {offsets = [0, 3, 0, 0], sizes = [2, 1, 8, 128], strides = [1, 1, 1, 1]} : vector<2x4x8x128xf32> to vector<2x1x8x128xf32>
    %104 = vector.shape_cast %103 : vector<2x1x8x128xf32> to vector<2x8x128xf32>
    %105 = vector.extract_strided_slice %10 {offsets = [0, 3, 0, 0], sizes = [2, 1, 8, 128], strides = [1, 1, 1, 1]} : vector<2x4x8x128xf32> to vector<2x1x8x128xf32>
    %106 = vector.shape_cast %105 : vector<2x1x8x128xf32> to vector<2x8x128xf32>
    %107 = arith.mulf %106, %14 : vector<2x8x128xf32>
    %c3_i32 = arith.constant 3 : i32
    %108 = vector.broadcast %c3_i32 : i32 to vector<2x8x128xi32>
    %109 = arith.cmpi eq, %5, %108 : vector<2x8x128xi32>
    %110 = arith.mulf %107, %107 : vector<2x8x128xf32>
    %cst_43 = arith.constant 0.000000e+00 : f32
    %111 = vector.broadcast %cst_43 : f32 to vector<2x8x128xf32>
    %112 = arith.select %18, %110, %111 : vector<2x8x128xi1>, vector<2x8x128xf32>
    %cst_44 = arith.constant 0.000000e+00 : f32
    %113 = vector.broadcast %cst_44 : f32 to vector<2x8x128xf32>
    %114 = arith.select %109, %107, %113 : vector<2x8x128xi1>, vector<2x8x128xf32>
    %cst_45 = arith.constant dense<0.000000e+00> : vector<2x128xf32>
    %115 = vector.multi_reduction <add>, %114, %cst_45 [1] : vector<2x8x128xf32> to vector<2x128xf32>
    %cst_46 = arith.constant dense<0.000000e+00> : vector<2xf32>
    %116 = vector.multi_reduction <add>, %115, %cst_46 [1] : vector<2x128xf32> to vector<2xf32>
    %117 = vector.shape_cast %116 : vector<2xf32> to vector<2x1xf32>
    %cst_47 = arith.constant dense<0.000000e+00> : vector<2x128xf32>
    %118 = vector.multi_reduction <add>, %112, %cst_47 [1] : vector<2x8x128xf32> to vector<2x128xf32>
    %cst_48 = arith.constant dense<0.000000e+00> : vector<2xf32>
    %119 = vector.multi_reduction <add>, %118, %cst_48 [1] : vector<2x128xf32> to vector<2xf32>
    %120 = vector.shape_cast %119 : vector<2xf32> to vector<2x1xf32>
    %121 = arith.extui %109 : vector<2x8x128xi1> to vector<2x8x128xi32>
    %122 = arith.sitofp %121 : vector<2x8x128xi32> to vector<2x8x128xf32>
    %cst_49 = arith.constant dense<0.000000e+00> : vector<2x128xf32>
    %123 = vector.multi_reduction <add>, %122, %cst_49 [1] : vector<2x8x128xf32> to vector<2x128xf32>
    %cst_50 = arith.constant dense<0.000000e+00> : vector<2xf32>
    %124 = vector.multi_reduction <add>, %123, %cst_50 [1] : vector<2x128xf32> to vector<2xf32>
    %125 = vector.shape_cast %124 : vector<2xf32> to vector<2x1xf32>
    %cst_51 = arith.constant 0.000000e+00 : f32
    %126 = vector.broadcast %cst_51 : f32 to vector<2x8x128xf32>
    %127 = arith.select %109, %104, %126 : vector<2x8x128xi1>, vector<2x8x128xf32>
    %cst_52 = arith.constant dense<0.000000e+00> : vector<2x128xf32>
    %128 = vector.multi_reduction <add>, %127, %cst_52 [1] : vector<2x8x128xf32> to vector<2x128xf32>
    %cst_53 = arith.constant dense<0.000000e+00> : vector<2xf32>
    %129 = vector.multi_reduction <add>, %128, %cst_53 [1] : vector<2x128xf32> to vector<2xf32>
    %130 = vector.shape_cast %129 : vector<2xf32> to vector<2x1xf32>
    %131 = tpu.concatenate %33, %61, %89, %117 in 1 : vector<2x1xf32>, vector<2x1xf32>, vector<2x1xf32>, vector<2x1xf32> -> vector<2x4xf32>
    %132 = tpu.concatenate %36, %64, %92, %120 in 1 : vector<2x1xf32>, vector<2x1xf32>, vector<2x1xf32>, vector<2x1xf32> -> vector<2x4xf32>
    %133 = tpu.concatenate %41, %69, %97, %125 in 1 : vector<2x1xf32>, vector<2x1xf32>, vector<2x1xf32>, vector<2x1xf32> -> vector<2x4xf32>
    %134 = tpu.concatenate %46, %74, %102, %130 in 1 : vector<2x1xf32>, vector<2x1xf32>, vector<2x1xf32>, vector<2x1xf32> -> vector<2x4xf32>
    %cst_54 = arith.constant 0.000000e+00 : f32
    %135 = vector.broadcast %cst_54 : f32 to vector<2x8x128xf32>
    %136 = arith.select %18, %16, %135 : vector<2x8x128xi1>, vector<2x8x128xf32>
    %cst_55 = arith.constant dense<0.000000e+00> : vector<2x128xf32>
    %137 = vector.multi_reduction <add>, %136, %cst_55 [1] : vector<2x8x128xf32> to vector<2x128xf32>
    %cst_56 = arith.constant dense<0.000000e+00> : vector<2xf32>
    %138 = vector.multi_reduction <add>, %137, %cst_56 [1] : vector<2x128xf32> to vector<2xf32>
    %139 = vector.shape_cast %138 : vector<2xf32> to vector<2x1xf32>
    %140 = vector.shape_cast %139 : vector<2x1xf32> to vector<2x1xf32>
    %141 = vector.broadcast %140 : vector<2x1xf32> to vector<2x4xf32>
    %c0_57 = arith.constant 0 : index
    %c0_58 = arith.constant 0 : index
    %c0_59 = arith.constant 0 : index
    %c0_60 = arith.constant 0 : index
    %142 = vector.load %arg4[%c0_57, %c0_58, %c0_59, %c0_60] : memref<1x5x2x4xf32, #tpu.memory_space<vmem>>, vector<1x1x2x4xf32>
    %143 = vector.shape_cast %142 : vector<1x1x2x4xf32> to vector<2x4xf32>
    %144 = arith.addf %143, %131 : vector<2x4xf32>
    %c0_61 = arith.constant 0 : index
    %c0_62 = arith.constant 0 : index
    %c0_63 = arith.constant 0 : index
    %c0_64 = arith.constant 0 : index
    %145 = vector.load %arg4[%c0_61, %c0_62, %c0_63, %c0_64] : memref<1x5x2x4xf32, #tpu.memory_space<vmem>>, vector<1x1x2x4xf32>
    %146 = vector.shape_cast %145 : vector<1x1x2x4xf32> to vector<2x4xf32>
    %147 = vector.shape_cast %144 : vector<2x4xf32> to vector<1x1x2x4xf32>
    tpu.vector_store %arg4[%c0_61, %c0_62, %c0_63, %c0_64], %147 {strides = array<i32>} : memref<1x5x2x4xf32, #tpu.memory_space<vmem>>, vector<1x1x2x4xf32>,
    %c0_65 = arith.constant 0 : index
    %c1 = arith.constant 1 : index
    %c0_66 = arith.constant 0 : index
    %c0_67 = arith.constant 0 : index
    %148 = vector.load %arg4[%c0_65, %c1, %c0_66, %c0_67] : memref<1x5x2x4xf32, #tpu.memory_space<vmem>>, vector<1x1x2x4xf32>
    %149 = vector.shape_cast %148 : vector<1x1x2x4xf32> to vector<2x4xf32>
    %150 = arith.addf %149, %132 : vector<2x4xf32>
    %c0_68 = arith.constant 0 : index
    %c1_69 = arith.constant 1 : index
    %c0_70 = arith.constant 0 : index
    %c0_71 = arith.constant 0 : index
    %151 = vector.load %arg4[%c0_68, %c1_69, %c0_70, %c0_71] : memref<1x5x2x4xf32, #tpu.memory_space<vmem>>, vector<1x1x2x4xf32>
    %152 = vector.shape_cast %151 : vector<1x1x2x4xf32> to vector<2x4xf32>
    %153 = vector.shape_cast %150 : vector<2x4xf32> to vector<1x1x2x4xf32>
    tpu.vector_store %arg4[%c0_68, %c1_69, %c0_70, %c0_71], %153 {strides = array<i32>} : memref<1x5x2x4xf32, #tpu.memory_space<vmem>>, vector<1x1x2x4xf32>,
    %c0_72 = arith.constant 0 : index
    %c2 = arith.constant 2 : index
    %c0_73 = arith.constant 0 : index
    %c0_74 = arith.constant 0 : index
    %154 = vector.load %arg4[%c0_72, %c2, %c0_73, %c0_74] : memref<1x5x2x4xf32, #tpu.memory_space<vmem>>, vector<1x1x2x4xf32>
    %155 = vector.shape_cast %154 : vector<1x1x2x4xf32> to vector<2x4xf32>
    %156 = arith.addf %155, %133 : vector<2x4xf32>
    %c0_75 = arith.constant 0 : index
    %c2_76 = arith.constant 2 : index
    %c0_77 = arith.constant 0 : index
    %c0_78 = arith.constant 0 : index
    %157 = vector.load %arg4[%c0_75, %c2_76, %c0_77, %c0_78] : memref<1x5x2x4xf32, #tpu.memory_space<vmem>>, vector<1x1x2x4xf32>
    %158 = vector.shape_cast %157 : vector<1x1x2x4xf32> to vector<2x4xf32>
    %159 = vector.shape_cast %156 : vector<2x4xf32> to vector<1x1x2x4xf32>
    tpu.vector_store %arg4[%c0_75, %c2_76, %c0_77, %c0_78], %159 {strides = array<i32>} : memref<1x5x2x4xf32, #tpu.memory_space<vmem>>, vector<1x1x2x4xf32>,
    %c0_79 = arith.constant 0 : index
    %c3 = arith.constant 3 : index
    %c0_80 = arith.constant 0 : index
    %c0_81 = arith.constant 0 : index
    %160 = vector.load %arg4[%c0_79, %c3, %c0_80, %c0_81] : memref<1x5x2x4xf32, #tpu.memory_space<vmem>>, vector<1x1x2x4xf32>
    %161 = vector.shape_cast %160 : vector<1x1x2x4xf32> to vector<2x4xf32>
    %162 = arith.addf %161, %134 : vector<2x4xf32>
    %c0_82 = arith.constant 0 : index
    %c3_83 = arith.constant 3 : index
    %c0_84 = arith.constant 0 : index
    %c0_85 = arith.constant 0 : index
    %163 = vector.load %arg4[%c0_82, %c3_83, %c0_84, %c0_85] : memref<1x5x2x4xf32, #tpu.memory_space<vmem>>, vector<1x1x2x4xf32>
    %164 = vector.shape_cast %163 : vector<1x1x2x4xf32> to vector<2x4xf32>
    %165 = vector.shape_cast %162 : vector<2x4xf32> to vector<1x1x2x4xf32>
    tpu.vector_store %arg4[%c0_82, %c3_83, %c0_84, %c0_85], %165 {strides = array<i32>} : memref<1x5x2x4xf32, #tpu.memory_space<vmem>>, vector<1x1x2x4xf32>,
    %c0_86 = arith.constant 0 : index
    %c4 = arith.constant 4 : index
    %c0_87 = arith.constant 0 : index
    %c0_88 = arith.constant 0 : index
    %166 = vector.load %arg4[%c0_86, %c4, %c0_87, %c0_88] : memref<1x5x2x4xf32, #tpu.memory_space<vmem>>, vector<1x1x2x4xf32>
    %167 = vector.shape_cast %166 : vector<1x1x2x4xf32> to vector<2x4xf32>
    %168 = arith.addf %167, %141 : vector<2x4xf32>
    %c0_89 = arith.constant 0 : index
    %c4_90 = arith.constant 4 : index
    %c0_91 = arith.constant 0 : index
    %c0_92 = arith.constant 0 : index
    %169 = vector.load %arg4[%c0_89, %c4_90, %c0_91, %c0_92] : memref<1x5x2x4xf32, #tpu.memory_space<vmem>>, vector<1x1x2x4xf32>
    %170 = vector.shape_cast %169 : vector<1x1x2x4xf32> to vector<2x4xf32>
    %171 = vector.shape_cast %168 : vector<2x4xf32> to vector<1x1x2x4xf32>
    tpu.vector_store %arg4[%c0_89, %c4_90, %c0_91, %c0_92], %171 {strides = array<i32>} : memref<1x5x2x4xf32, #tpu.memory_space<vmem>>, vector<1x1x2x4xf32>,
    return
  }
  func.func @transform_0(%arg0: i32, %arg1: i32) -> (i32, i32, i32, i32) {
    %c1_i32 = arith.constant 1 : i32
    %0 = arith.muli %arg0, %c1_i32 : i32
    %1 = arith.addi %0, %arg1 : i32
    %c0_i32 = arith.constant 0 : i32
    %c0_i32_0 = arith.constant 0 : i32
    %c0_i32_1 = arith.constant 0 : i32
    %c0_i32_2 = arith.constant 0 : i32
    return %c0_i32, %c0_i32_0, %1, %c0_i32_1 : i32, i32, i32, i32
  }
  func.func @transform_1(%arg0: i32, %arg1: i32) -> (i32, i32, i32) {
    %c1_i32 = arith.constant 1 : i32
    %0 = arith.muli %arg0, %c1_i32 : i32
    %1 = arith.addi %0, %arg1 : i32
    %c0_i32 = arith.constant 0 : i32
    %c0_i32_0 = arith.constant 0 : i32
    %c0_i32_1 = arith.constant 0 : i32
    return %c0_i32, %1, %c0_i32_0 : i32, i32, i32
  }
  func.func @transform_2(%arg0: i32, %arg1: i32) -> (i32, i32, i32, i32) {
    %c0_i32 = arith.constant 0 : i32
    %c0_i32_0 = arith.constant 0 : i32
    %c0_i32_1 = arith.constant 0 : i32
    %c0_i32_2 = arith.constant 0 : i32
    return %arg0, %c0_i32, %c0_i32_0, %c0_i32_1 : i32, i32, i32, i32
  }
}

</mosaic_0001>

<bundles_post_ra>
// kernel: dice_ce_loss.1
= control target key start
LH: loop header
LB: loop body
LE: loop exit
PB: predicated region body
PF: predicated region fallthrough
CT: control target
= control target key end

     0   :  { %v598_v11 = vmov 0.0   ;;  %vm135_vm4 = vcmask 1041409   ;;  %vm138_vm7 = vcmask 1041408   ;;  %vm49_vm10 = vcmask 25600   ;;  %s928_s1 = inlined_call_operand.vmem [shape: s8[2,8,128], index: 1, kind: input, shape index: {}]   ;;  %s929_s0 = inlined_call_operand.vmem [shape: f32[2,4,8,128], index: 0, kind: input, shape index: {}]   ;;  %s930_s2 = inlined_call_operand.vmem [shape: f32[1,5,2,4], index: 2, kind: output, shape index: {}]  }
   0x1   :  { %v570_v0 = vld [vmem:[%s928_s1] sm:$0xf]   ;;  %v623_v2 = vld [vmem:[%s929_s0 + $0x8] sm:$0xff]  ;;  %v632_v5 = vld [vmem:[%s929_s0 + $0x10] sm:$0xff]  ;;  %52 = vst.msk [vmem:[%s930_s2 + $0x4] sm:$0x3] %vm49_vm10, %v598_v11 }
   0x2   :  { %v55_v1 = vld [vmem:[%s929_s0] sm:$0xff]  ;;  %v625_v3 = vunpack.c.0.s8 %v570_v0  ;;  %v627_v4 = vunpack.c.1.s8 %v570_v0  ;;  %v58_v6 = vld [vmem:[%s929_s0 + $0x18] sm:$0xff]  ;;  %v649_v10 = vld [vmem:[%s929_s0 + $0x30] sm:$0xff]  ;;  %50 = vst.msk [vmem:[%s930_s2] sm:$0x3] %vm49_vm10, %v598_v11  ;;  %vm481_vm13 = vcmask 7168  }
   0x3   :  { %v67_v7 = vmax.f32 %v55_v1, %v632_v5  ;;  %v68_v8 = vmax.f32 %v623_v2, %v58_v6  ;;  %v59_v9 = vld [vmem:[%s929_s0 + $0x20] sm:$0xff]  ;;  %v666_v20 = vld [vmem:[%s929_s0 + $0x28] sm:$0xff]  ;;  %v62_v21 = vld [vmem:[%s929_s0 + $0x38] sm:$0xff]  ;;  %51 = vst.msk [vmem:[%s930_s2 + $0x2] sm:$0x3] %vm49_vm10, %v598_v11  ;;  %vm483_vm14 = vcmask 15360  }
   0x4   :  { %vm207_vm0 = vcmp.eq.s32.totalorder %v625_v3, 1  ;;  %vm208_vm1 = vcmp.eq.s32.totalorder %v627_v4, 1  ;;  %vm113_vm2 = vcmp.eq.s32.totalorder %v625_v3, 0  ;;  %vm114_vm3 = vcmp.eq.s32.totalorder %v627_v4, 0  ;;  %53 = vst.msk [vmem:[%s930_s2 + $0x6] sm:$0x3] %vm49_vm10, %v598_v11 }
   0x5   :  { %v555_v12 = vsel %vm207_vm0, 1.0, %v598_v11  ;;  %v556_v13 = vsel %vm208_vm1, 1.0, %v598_v11  ;;  %v553_v14 = vsel %vm113_vm2, 1.0, %v598_v11  ;;  %v554_v15 = vsel %vm114_vm3, 1.0, %v598_v11  ;;  %54 = vst.msk [vmem:[%s930_s2 + $0x8] sm:$0x3] %vm49_vm10, %v598_v11 }
   0x6   :  { %v257_v16 = vrot.slane %v555_v12, 4  ;;  %v263_v17 = vrot.slane %v556_v13, 4  ;;  %v165_v18 = vrot.slane %v553_v14, 4  ;;  %v171_v19 = vrot.slane %v554_v15, 4 }
   0x7   :  { %vm299_vm5 = vcmp.eq.s32.totalorder %v625_v3, 2  ;;  %vm300_vm6 = vcmp.eq.s32.totalorder %v627_v4, 2  ;;  %v673_v22 = vmax.f32 %v67_v7, %v68_v8  ;;  %v70_v23 = vmax.f32 %v59_v9, %v649_v10 }
   0x8   :  { %v258_v24 = vadd.f32 %v555_v12, %v257_v16  ;;  %v264_v25 = vadd.f32 %v556_v13, %v263_v17  ;;  %v166_v26 = vadd.f32 %v553_v14, %v165_v18  ;;  %v172_v27 = vadd.f32 %v554_v15, %v171_v19 }
   0x9   :  { %v557_v28 = vsel %vm299_vm5, 1.0, %v598_v11  ;;  %v558_v29 = vsel %vm300_vm6, 1.0, %v598_v11  ;;  %v71_v30 = vmax.f32 %v666_v20, %v62_v21  ;;  %v73_v31 = vsub.f32 %v55_v1, %v673_v22 }
   0xa   :  { %v259_v32 = vrot.slane %v258_v24, 2  ;;  %v265_v33 = vrot.slane %v264_v25, 2  ;;  %v167_v34 = vrot.slane %v166_v26, 2  ;;  %v173_v35 = vrot.slane %v172_v27, 2 }
   0xb   :  { %v349_v36 = vrot.slane %v557_v28, 4  ;;  %v355_v37 = vrot.slane %v558_v29, 4  ;;  %v684_v38 = vmax.f32 %v70_v23, %v71_v30  ;;  %v687_v39 = vsub.f32 %v58_v6, %v673_v22 }
   0xc   :  { %v260_v40 = vadd.f32 %v259_v32, %v258_v24  ;;  %v266_v41 = vadd.f32 %v265_v33, %v264_v25  ;;  %v168_v42 = vadd.f32 %v167_v34, %v166_v26  ;;  %v174_v43 = vadd.f32 %v173_v35, %v172_v27 }
   0xd   :  { %v350_v44 = vadd.f32 %v557_v28, %v349_v36  ;;  %v356_v45 = vadd.f32 %v558_v29, %v355_v37  ;;  %v77_v46 = vsub.f32 %v59_v9, %v684_v38  ;;  %v691_v47 = vsub.f32 %v62_v21, %v684_v38 }
   0xe   :  { %v261_v48 = vrot.slane %v260_v40, 1  ;;  %v267_v49 = vrot.slane %v266_v41, 1  ;;  %v169_v50 = vrot.slane %v168_v42, 1  ;;  %v175_v51 = vrot.slane %v174_v43, 1 }
   0xf   :  { %v351_v52 = vrot.slane %v350_v44, 2  ;;  %v357_v53 = vrot.slane %v356_v45, 2  ;;  %v87_v54 = vmul.f32 1.442695, %v687_v39  ;;  %v89_v55 = vmul.f32 1.442695, %v77_v46 }
  0x10   :  { %v262_v56 = vadd.f32 %v261_v48, %v260_v40  ;;  %v268_v57 = vadd.f32 %v267_v49, %v266_v41  ;;  %v170_v58 = vadd.f32 %v169_v50, %v168_v42  ;;  %v176_v59 = vadd.f32 %v175_v51, %v174_v43 }
  0x11   :  { %v352_v60 = vadd.f32 %v351_v52, %v350_v44  ;;  %v358_v61 = vadd.f32 %v357_v53, %v356_v45  ;;  %574 = vpow2.f32 %v87_v54  ;;  %v95_v62 = vmul.f32 1.442695, %v691_v47 }
  0x12   :  { %v271_v63 = vsel %vm135_vm4, %v268_v57, %v262_v56  ;;  %v179_v0 = vsel %vm135_vm4, %v176_v59, %v170_v58  ;;  %576 = vpow2.f32 %v89_v55  ;;  %v184_v1 = vsel %vm113_vm2, %v73_v31, 0.0 }
  0x13   :  { %v273_v6 = vsel %vm138_vm7, %v271_v63, 0.0  ;;  %v181_v7 = vsel %vm138_vm7, %v179_v0, 0.0  ;;  %v353_v8 = vrot.slane %v352_v60, 1  ;;  %v359_v9 = vrot.slane %v358_v61, 1 }
  0x14   :  { %274 = vadd.xlane.f32.xlu0 %v273_v6  ;;  %182 = vadd.xlane.f32.xlu1 %v181_v7  ;;  %578 = vpow2.f32 %v95_v62  ;;  %v185_v12 = vsel %vm114_vm3, %v77_v46, 0.0  ;;  %v186_v13 = vrot.slane %v184_v1, 4  ;;  %v81_v14 = vmul.f32 1.442695, %v73_v31 }
  0x15   :  { %v354_v15 = vadd.f32 %v353_v8, %v352_v60  ;;  %v360_v16 = vadd.f32 %v359_v9, %v358_v61  ;;  %v192_v17 = vrot.slane %v185_v12, 4  ;;  %vm391_vm8 = vcmp.eq.s32.totalorder %v625_v3, 3 }
  0x16   :  { %v187_v18 = vadd.f32 %v186_v13, %v184_v1  ;;  %580 = vpow2.f32 %v81_v14  ;;  %vm392_vm9 = vcmp.eq.s32.totalorder %v627_v4, 3  ;;  %v559_v19 = vsel %vm391_vm8, 1.0, %v598_v11 }
  0x17   :  { %v363_v21 = vsel %vm135_vm4, %v360_v16, %v354_v15  ;;  %v193_v23 = vadd.f32 %v192_v17, %v185_v12  ;;  %v560_v24 = vsel %vm392_vm9, 1.0, %v598_v11  ;;  %v441_v25 = vrot.slane %v559_v19, 4 }
  0x18   :  { %v365_v26 = vsel %vm138_vm7, %v363_v21, 0.0  ;;  %v188_v27 = vrot.slane %v187_v18, 2  ;;  %v447_v28 = vrot.slane %v560_v24, 4  ;;  %v74_v29 = vsub.f32 %v623_v2, %v673_v22 }
  0x19   :  { %366 = vadd.xlane.f32.xlu0 %v365_v26  ;;  %v194_v30 = vrot.slane %v193_v23, 2  ;;  %v442_v31 = vadd.f32 %v559_v19, %v441_v25  ;;  %v78_v32 = vsub.f32 %v666_v20, %v684_v38  ;;  %v75_v33 = vsub.f32 %v632_v5, %v673_v22 }
  0x1a   :  { %v189_v34 = vadd.f32 %v188_v27, %v187_v18  ;;  %v448_v35 = vadd.f32 %v560_v24, %v447_v28  ;;  %v83_v36 = vmul.f32 1.442695, %v74_v29  ;;  %v276_v37 = vsel %vm207_vm0, %v74_v29, 0.0 }
  0x1b   :  { %v195_v40 = vadd.f32 %v194_v30, %v193_v23  ;;  %v443_v41 = vrot.slane %v442_v31, 2  ;;  %v91_v42 = vmul.f32 1.442695, %v78_v32  ;;  %v277_v2 = vsel %vm208_vm1, %v78_v32, 0.0 }
  0x1c   :  { %v190_v43 = vrot.slane %v189_v34, 1  ;;  %v449_v44 = vrot.slane %v448_v35, 2  ;;  %582 = vpow2.f32 %v83_v36  ;;  %v278_v45 = vrot.slane %v276_v37, 4 }
  0x1d   :  { %v196_v20 = vrot.slane %v195_v40, 1  ;;  %v444_v46 = vadd.f32 %v443_v41, %v442_v31  ;;  %584 = vpow2.f32 %v91_v42  ;;  %v284_v5 = vrot.slane %v277_v2, 4 }
  0x1e   :  { %v723_v22 = vpop.eup %574  ;;  %v191_v48 = vadd.f32 %v190_v43, %v189_v34  ;;  %v450_v49 = vadd.f32 %v449_v44, %v448_v35  ;;  %v279_v50 = vadd.f32 %v278_v45, %v276_v37  ;;  %v79_v51 = vsub.f32 %v649_v10, %v684_v38 }
  0x1f   :  { %v727_v52 = vpop.eup %576  ;;  %v197_v53 = vadd.f32 %v196_v20, %v195_v40  ;;  %v445_v54 = vrot.slane %v444_v46, 1  ;;  %v285_v55 = vadd.f32 %v284_v5, %v277_v2  ;;  %v85_v56 = vmul.f32 1.442695, %v75_v33 }
  0x20   :  { %v451_v57 = vrot.slane %v450_v49, 1  ;;  %v280_v58 = vrot.slane %v279_v50, 2  ;;  %v93_v59 = vmul.f32 1.442695, %v79_v51  ;;  %v368_v60 = vsel %vm299_vm5, %v75_v33, 0.0 }
  0x21   :  { %v731_v61 = vpop.eup %578  ;;  %v200_v62 = vsel %vm135_vm4, %v197_v53, %v191_v48  ;;  %v446_v63 = vadd.f32 %v445_v54, %v444_v46  ;;  %v286_v0 = vrot.slane %v285_v55, 2  ;;  %586 = vpow2.f32 %v85_v56 }
  0x22   :  { %v202_v10 = vsel %vm138_vm7, %v200_v62, 0.0  ;;  %v452_v38 = vadd.f32 %v451_v57, %v450_v49  ;;  %v281_v1 = vadd.f32 %v280_v58, %v279_v50  ;;  %588 = vpow2.f32 %v93_v59 }
  0x23   :  { %v735_v6 = vpop.eup %580  ;;  %203 = vadd.xlane.f32.xlu1 %v202_v10  ;;  %v287_v7 = vadd.f32 %v286_v0, %v285_v55  ;;  %v369_v8 = vsel %vm300_vm6, %v79_v51, 0.0  ;;  %v370_v9 = vrot.slane %v368_v60, 4  ;;  %v460_v18 = vsel %vm391_vm8, %v687_v39, 0.0 }
  0x24   :  { %v455_v12 = vsel %vm135_vm4, %v452_v38, %v446_v63  ;;  %v282_v13 = vrot.slane %v281_v1, 1  ;;  %v376_v14 = vrot.slane %v369_v8, 4  ;;  %v461_v23 = vsel %vm392_vm9, %v691_v47, 0.0 }
  0x25   :  { %v457_v15 = vsel %vm138_vm7, %v455_v12, 0.0  ;;  %v288_v16 = vrot.slane %v287_v7, 1  ;;  %v371_v17 = vadd.f32 %v370_v9, %v368_v60  ;;  %v462_v24 = vrot.slane %v460_v18, 4 }
  0x26   :  { %458 = vadd.xlane.f32.xlu0 %v457_v15  ;;  %v283_v19 = vadd.f32 %v282_v13, %v281_v1  ;;  %v377_v21 = vadd.f32 %v376_v14, %v369_v8  ;;  %v468_v27 = vrot.slane %v461_v23, 4  ;;  %vm109_vm11 = vcmp.ge.s32.totalorder %v625_v3, 0 }
  0x27   :  { %v289_v25 = vadd.f32 %v288_v16, %v287_v7  ;;  %v372_v26 = vrot.slane %v371_v17, 2  ;;  %v463_v29 = vadd.f32 %v462_v24, %v460_v18  ;;  %vm110_vm12 = vcmp.ge.s32.totalorder %v627_v4, 0 }
  0x28   :  { %v378_v28 = vrot.slane %v377_v21, 2  ;;  %v469_v33 = vadd.f32 %v468_v27, %v461_v23  ;;  %vm485_vm15 = vcmask 23552  }
  0x29   :  { %v583_v30 = vpop.eup %582  ;;  %v292_v31 = vsel %vm135_vm4, %v289_v25, %v283_v19  ;;  %v373_v32 = vadd.f32 %v372_v26, %v371_v17  ;;  %v464_v36 = vrot.slane %v463_v29, 2 }
  0x2a   :  { %v585_v34 = vpop.eup %584  ;;  %v294_v39 = vsel %vm138_vm7, %v292_v31, 0.0  ;;  %v379_v35 = vadd.f32 %v378_v28, %v377_v21  ;;  %v97_v37 = vadd.f32 %v583_v30, %v735_v6  ;;  %v470_v40 = vrot.slane %v469_v33, 2 }
  0x2b   :  { %295 = vadd.xlane.f32.xlu1 %v294_v39  ;;  %v374_v47 = vrot.slane %v373_v32, 1  ;;  %v100_v41 = vadd.f32 %v585_v34, %v727_v52  ;;  %v465_v2 = vadd.f32 %v464_v36, %v463_v29 }
  0x2c   :  { %v380_v42 = vrot.slane %v379_v35, 1  ;;  %v471_v44 = vadd.f32 %v470_v40, %v469_v33 }
  0x2d   :  { %v375_v43 = vadd.f32 %v374_v47, %v373_v32  ;;  %v466_v46 = vrot.slane %v465_v2, 1 }
  0x2e   :  { %v587_v45 = vpop.eup %586  ;;  %v381_v20 = vadd.f32 %v380_v42, %v379_v35  ;;  %v472_v49 = vrot.slane %v471_v44, 1 }
  0x2f   :  { %v589_v5 = vpop.eup %588  ;;  %v98_v48 = vadd.f32 %v587_v45, %v97_v37  ;;  %v467_v53 = vadd.f32 %v466_v46, %v465_v2 }
  0x30   :  { %v101_v50 = vadd.f32 %v589_v5, %v100_v41  ;;  %v384_v51 = vsel %vm135_vm4, %v381_v20, %v375_v43  ;;  %v473_v56 = vadd.f32 %v472_v49, %v471_v44 }
  0x31   :  { %v386_v54 = vsel %vm138_vm7, %v384_v51, 0.0  ;;  %v99_v55 = vadd.f32 %v723_v22, %v98_v48 }
  0x32   :  { %v102_v57 = vadd.f32 %v731_v61, %v101_v50  ;;  %387 = vadd.xlane.f32.xlu1 %v386_v54  ;;  %v781_v11 = vsel %vm135_vm4, %v473_v56, %v467_v53 }
  0x33   :  { %590 = vrcp.f32 %v99_v55  ;;  %v478_v3 = vsel %vm138_vm7, %v781_v11, 0.0 }
  0x34   :  { %592 = vrcp.f32 %v102_v57 }
  0x35   :  { %594 = vlog2.f32 %v99_v55 }
  0x36   :  { %596 = vlog2.f32 %v102_v57 }
  0x40   :  { %v591_v58 = vpop.eup %590 }
  0x41   :  { %v593_v59 = vpop.eup %592  ;;  %v786_v60 = vmul.f32 %v591_v58, %v735_v6  ;;  %v205_v62 = vmul.f32 %v591_v58, %v583_v30  ;;  %v788_v63 = vmul.f32 %v591_v58, %v587_v45  ;;  %v791_v0 = vmul.f32 %v591_v58, %v723_v22 }
  0x42   :  { %v794_v10 = vmul.f32 %v593_v59, %v727_v52  ;;  %v206_v38 = vmul.f32 %v593_v59, %v585_v34  ;;  %v796_v1 = vmul.f32 %v593_v59, %v589_v5  ;;  %v799_v7 = vmul.f32 %v593_v59, %v731_v61  ;;  %v823_v43 = vpop.eup %594 }
  0x43   :  { %v119_v6 = vsel %vm113_vm2, %v786_v60, 0.0  ;;  %v209_v8 = vmul.f32 %v205_v62, %v205_v62  ;;  %v213_v9 = vsel %vm207_vm0, %v205_v62, 0.0  ;;  %v301_v22 = vmul.f32 %v788_v63, %v788_v63  ;;  %v825_v5 = vpop.eup %596 }
  0x44   :  { %v120_v52 = vsel %vm114_vm3, %v794_v10, 0.0  ;;  %v121_v12 = vrot.slane %v119_v6, 4  ;;  %v210_v13 = vmul.f32 %v206_v38, %v206_v38  ;;  %v214_v61 = vsel %vm208_vm1, %v206_v38, 0.0 }
  0x45   :  { %v127_v14 = vrot.slane %v120_v52, 4  ;;  %v211_v15 = vsel %vm109_vm11, %v209_v8, 0.0  ;;  %v215_v16 = vrot.slane %v213_v9, 4  ;;  %v221_v17 = vrot.slane %v214_v61, 4 }
  0x46   :  { %v122_v18 = vadd.f32 %v121_v12, %v119_v6  ;;  %v212_v19 = vsel %vm110_vm12, %v210_v13, 0.0  ;;  %v234_v21 = vrot.slane %v211_v15, 4  ;;  %v302_v23 = vmul.f32 %v796_v1, %v796_v1 }
  0x47   :  { %v128_v24 = vadd.f32 %v127_v14, %v120_v52  ;;  %v240_v25 = vrot.slane %v212_v19, 4  ;;  %v216_v26 = vadd.f32 %v215_v16, %v213_v9  ;;  %v222_v27 = vadd.f32 %v221_v17, %v214_v61 }
  0x48   :  { %v123_v28 = vrot.slane %v122_v18, 2  ;;  %v235_v29 = vadd.f32 %v234_v21, %v211_v15  ;;  %v303_v30 = vsel %vm109_vm11, %v301_v22, 0.0  ;;  %v304_v31 = vsel %vm110_vm12, %v302_v23, 0.0 }
  0x49   :  { %v129_v32 = vrot.slane %v128_v24, 2  ;;  %v241_v33 = vadd.f32 %v240_v25, %v212_v19  ;;  %v217_v34 = vrot.slane %v216_v26, 2  ;;  %v223_v39 = vrot.slane %v222_v27, 2 }
  0x4a   :  { %v124_v35 = vadd.f32 %v123_v28, %v122_v18  ;;  %v236_v36 = vrot.slane %v235_v29, 2  ;;  %v326_v37 = vrot.slane %v303_v30, 4  ;;  %v332_v47 = vrot.slane %v304_v31, 4 }
  0x4b   :  { %v130_v40 = vadd.f32 %v129_v32, %v128_v24  ;;  %v242_v41 = vrot.slane %v241_v33, 2  ;;  %v218_v42 = vadd.f32 %v217_v34, %v216_v26  ;;  %v224_v2 = vadd.f32 %v223_v39, %v222_v27 }
  0x4c   :  { %v125_v44 = vrot.slane %v124_v35, 1  ;;  %v237_v45 = vadd.f32 %v236_v36, %v235_v29  ;;  %v327_v20 = vadd.f32 %v326_v37, %v303_v30  ;;  %v333_v46 = vadd.f32 %v332_v47, %v304_v31 }
  0x4d   :  { %v131_v48 = vrot.slane %v130_v40, 1  ;;  %v243_v49 = vadd.f32 %v242_v41, %v241_v33  ;;  %v219_v50 = vrot.slane %v218_v42, 1  ;;  %v225_v51 = vrot.slane %v224_v2, 1 }
  0x4e   :  { %v126_v53 = vadd.f32 %v125_v44, %v124_v35  ;;  %v238_v54 = vrot.slane %v237_v45, 1  ;;  %v328_v55 = vrot.slane %v327_v20, 2  ;;  %v334_v56 = vrot.slane %v333_v46, 2 }
  0x4f   :  { %v132_v57 = vadd.f32 %v131_v48, %v130_v40  ;;  %v244_v58 = vrot.slane %v243_v49, 1  ;;  %v220_v59 = vadd.f32 %v219_v50, %v218_v42  ;;  %v226_v62 = vadd.f32 %v225_v51, %v224_v2 }
  0x50   :  { %v239_v38 = vadd.f32 %v238_v54, %v237_v45  ;;  %v329_v6 = vadd.f32 %v328_v55, %v327_v20  ;;  %v335_v8 = vadd.f32 %v334_v56, %v333_v46  ;;  %v305_v9 = vsel %vm299_vm5, %v788_v63, 0.0 }
  0x51   :  { %v136_v22 = vsel %vm135_vm4, %v132_v57, %v126_v53  ;;  %v245_v52 = vadd.f32 %v244_v58, %v243_v49  ;;  %v229_v12 = vsel %vm135_vm4, %v226_v62, %v220_v59  ;;  %v306_v13 = vsel %vm300_vm6, %v796_v1, 0.0 }
  0x52   :  { %v139_v61 = vsel %vm138_vm7, %v136_v22, 0.0  ;;  %v231_v14 = vsel %vm138_vm7, %v229_v12, 0.0  ;;  %v330_v15 = vrot.slane %v329_v6, 1  ;;  %v336_v16 = vrot.slane %v335_v8, 1 }
  0x53   :  { %140 = vadd.xlane.f32.xlu0 %v139_v61  ;;  %v248_v17 = vsel %vm135_vm4, %v245_v52, %v239_v38  ;;  %v307_v18 = vrot.slane %v305_v9, 4  ;;  %v313_v63 = vrot.slane %v306_v13, 4  ;;  %v393_v19 = vmul.f32 %v791_v0, %v791_v0 }
  0x54   :  { %v250_v21 = vsel %vm138_vm7, %v248_v17, 0.0  ;;  %v331_v23 = vadd.f32 %v330_v15, %v329_v6  ;;  %v337_v24 = vadd.f32 %v336_v16, %v335_v8  ;;  %v394_v1 = vmul.f32 %v799_v7, %v799_v7 }
  0x55   :  { %251 = vadd.xlane.f32.xlu1 %v250_v21  ;;  %v308_v25 = vadd.f32 %v307_v18, %v305_v9  ;;  %v314_v26 = vadd.f32 %v313_v63, %v306_v13  ;;  %v395_v27 = vsel %vm109_vm11, %v393_v19, 0.0  ;;  %v397_v28 = vsel %vm391_vm8, %v791_v0, 0.0 }
  0x56   :  { %v340_v29 = vsel %vm135_vm4, %v337_v24, %v331_v23  ;;  %v396_v30 = vsel %vm110_vm12, %v394_v1, 0.0  ;;  %v418_v31 = vrot.slane %v395_v27, 4  ;;  %v398_v32 = vsel %vm392_vm9, %v799_v7, 0.0 }
  0x57   :  { %232 = vadd.xlane.f32.xlu0 %v231_v14  ;;  %v342_v33 = vsel %vm138_vm7, %v340_v29, 0.0  ;;  %v309_v34 = vrot.slane %v308_v25, 2  ;;  %v315_v39 = vrot.slane %v314_v26, 2  ;;  %v424_v35 = vrot.slane %v396_v30, 4 }
  0x58   :  { %v419_v36 = vadd.f32 %v418_v31, %v395_v27  ;;  %v399_v37 = vrot.slane %v397_v28, 4  ;;  %v405_v47 = vrot.slane %v398_v32, 4  ;;  %v115_v0 = vmul.f32 %v786_v60, %v786_v60 }
  0x59   :  { %343 = vadd.xlane.f32.xlu1 %v342_v33  ;;  %v310_v40 = vadd.f32 %v309_v34, %v308_v25  ;;  %v316_v41 = vadd.f32 %v315_v39, %v314_v26  ;;  %v425_v42 = vadd.f32 %v424_v35, %v396_v30  ;;  %v116_v2 = vmul.f32 %v794_v10, %v794_v10 }
  0x5a   :  { %v420_v7 = vrot.slane %v419_v36, 2  ;;  %v400_v44 = vadd.f32 %v399_v37, %v397_v28  ;;  %v406_v45 = vadd.f32 %v405_v47, %v398_v32  ;;  %v117_v20 = vsel %vm109_vm11, %v115_v0, 0.0 }
  0x5b   :  { %v311_v46 = vrot.slane %v310_v40, 1  ;;  %v317_v48 = vrot.slane %v316_v41, 1  ;;  %v426_v49 = vrot.slane %v425_v42, 2  ;;  %v118_v50 = vsel %vm110_vm12, %v116_v2, 0.0 }
  0x5c   :  { %v421_v60 = vadd.f32 %v420_v7, %v419_v36  ;;  %v401_v51 = vrot.slane %v400_v44, 2  ;;  %v407_v53 = vrot.slane %v406_v45, 2  ;;  %v142_v54 = vrot.slane %v117_v20, 4 }
  0x5d   :  { %v312_v55 = vadd.f32 %v311_v46, %v310_v40  ;;  %v318_v56 = vadd.f32 %v317_v48, %v316_v41  ;;  %v427_v57 = vadd.f32 %v426_v49, %v425_v42  ;;  %v148_v10 = vrot.slane %v118_v50, 4  ;;  %v563_v46 = vld [vmem:[%s930_s2 + $0x4] sm:$0x3] }
  0x5e   :  { %v422_v58 = vrot.slane %v421_v60, 1  ;;  %v402_v59 = vadd.f32 %v401_v51, %v400_v44  ;;  %v408_v62 = vadd.f32 %v407_v53, %v406_v45  ;;  %v143_v38 = vadd.f32 %v142_v54, %v117_v20 }
  0x5f   :  { %v321_v6 = vsel %vm135_vm4, %v318_v56, %v312_v55  ;;  %v428_v8 = vrot.slane %v427_v57, 1  ;;  %v149_v9 = vadd.f32 %v148_v10, %v118_v50  ;;  %v106_v22 = vmul.f32 0.6931472, %v823_v43 }
  0x60   :  { %v323_v52 = vsel %vm138_vm7, %v321_v6, 0.0  ;;  %v423_v12 = vadd.f32 %v422_v58, %v421_v60  ;;  %v403_v13 = vrot.slane %v402_v59, 1  ;;  %v409_v61 = vrot.slane %v408_v62, 1 }
  0x61   :  { %324 = vadd.xlane.f32.xlu0 %v323_v52  ;;  %v429_v14 = vadd.f32 %v428_v8, %v427_v57  ;;  %v144_v15 = vrot.slane %v143_v38, 2  ;;  %v150_v16 = vrot.slane %v149_v9, 2  ;;  %v108_v17 = vmul.f32 0.6931472, %v825_v5  ;;  %v565_v52 = vld [vmem:[%s930_s2 + $0x6] sm:$0x3] }
  0x62   :  { %v404_v18 = vadd.f32 %v403_v13, %v402_v59  ;;  %v410_v63 = vadd.f32 %v409_v61, %v408_v62  ;;  %v496_v19 = vsel %vm109_vm11, %v106_v22, 0.0  ;;  %v517_v62 = vld [vmem:[%s930_s2] sm:$0x3] }
  0x63   :  { %v432_v21 = vsel %vm135_vm4, %v429_v14, %v423_v12  ;;  %v145_v23 = vadd.f32 %v144_v15, %v143_v38  ;;  %v151_v43 = vadd.f32 %v150_v16, %v149_v9  ;;  %v497_v24 = vsel %vm110_vm12, %v108_v17, 0.0  ;;  %v561_v16 = vld [vmem:[%s930_s2 + $0x2] sm:$0x3] }
  0x64   :  { %v434_v1 = vsel %vm138_vm7, %v432_v21, 0.0  ;;  %v413_v25 = vsel %vm135_vm4, %v410_v63, %v404_v18  ;;  %v498_v26 = vrot.slane %v496_v19, 4  ;;  %v504_v27 = vrot.slane %v497_v24, 4  ;;  %v567_v21 = vld [vmem:[%s930_s2 + $0x8] sm:$0x3] }
  0x65   :  { %435 = vadd.xlane.f32.xlu1 %v434_v1  ;;  %v415_v5 = vsel %vm138_vm7, %v413_v25, 0.0  ;;  %v146_v28 = vrot.slane %v145_v23, 1  ;;  %v152_v29 = vrot.slane %v151_v43, 1 }
  0x66   :  { %416 = vadd.xlane.f32.xlu0 %v415_v5  ;;  %v499_v30 = vadd.f32 %v498_v26, %v496_v19  ;;  %v505_v31 = vadd.f32 %v504_v27, %v497_v24 }
  0x67   :  { %v147_v32 = vadd.f32 %v146_v28, %v145_v23  ;;  %v153_v4 = vadd.f32 %v152_v29, %v151_v43 }
  0x68   :  { %v500_v33 = vrot.slane %v499_v30, 2  ;;  %v506_v34 = vrot.slane %v505_v31, 2 }
  0x69   :  { %479 = vadd.xlane.f32.xlu1 %v478_v3  ;;  %v156_v39 = vsel %vm135_vm4, %v153_v4, %v147_v32 }
  0x6a   :  { %v158_v35 = vsel %vm138_vm7, %v156_v39, 0.0  ;;  %v501_v36 = vadd.f32 %v500_v33, %v499_v30  ;;  %v507_v37 = vadd.f32 %v506_v34, %v505_v31 }
  0x6b   :  { %159 = vadd.xlane.f32.xlu0 %v158_v35 }
  0x6c   :  { %v502_v47 = vrot.slane %v501_v36, 1  ;;  %v508_v0 = vrot.slane %v507_v37, 1 }
  0x6e   :  { %v503_v40 = vadd.f32 %v502_v47, %v501_v36  ;;  %v509_v41 = vadd.f32 %v508_v0, %v507_v37 }
  0x70   :  { %v512_v11 = vsel %vm135_vm4, %v509_v41, %v503_v40 }
  0x71   :  { %v514_v42 = vsel %vm138_vm7, %v512_v11, 0.0 }
  0x72   :  { %515 = vadd.xlane.f32.xlu0 %v514_v42 }
  0x9d   :  { %v275_v2 = vpop.xlane.xlu0 %274  ;;  %v183_v7 = vpop.xlane.xlu1 %182 }
  0x9e   :  { %v490_v45 = vsel %vm481_vm13, %v183_v7, %v275_v2 }
  0xa2   :  { %v367_v44 = vpop.xlane.xlu0 %366 }
  0xa3   :  { %v491_v20 = vsel %vm483_vm14, %v490_v45, %v367_v44 }
  0xac   :  { %v204_v60 = vpop.xlane.xlu1 %203 }
  0xaf   :  { %v459_v48 = vpop.xlane.xlu0 %458 }
  0xb0   :  { %v492_v49 = vsel %vm485_vm15, %v491_v20, %v459_v48 }
  0xb1   :  { %v527_v50 = vadd.f32 %v563_v46, %v492_v49 }
  0xb3   :  { %564 = vst.msk [vmem:[%s930_s2 + $0x4] sm:$0x3] %vm49_vm10, %v527_v50 }
  0xb4   :  { %v296_v51 = vpop.xlane.xlu1 %295 }
  0xb5   :  { %v493_v38 = vsel %vm481_vm13, %v204_v60, %v296_v51 }
  0xbb   :  { %v388_v53 = vpop.xlane.xlu1 %387 }
  0xbc   :  { %v494_v12 = vsel %vm483_vm14, %v493_v38, %v388_v53 }
  0xdc   :  { %v141_v54 = vpop.xlane.xlu0 %140 }
  0xde   :  { %v252_v55 = vpop.xlane.xlu1 %251 }
  0xe0   :  { %v233_v56 = vpop.xlane.xlu0 %232 }
  0xe1   :  { %v482_v58 = vsel %vm481_vm13, %v141_v54, %v233_v56 }
  0xe2   :  { %v344_v57 = vpop.xlane.xlu1 %343 }
  0xea   :  { %v325_v10 = vpop.xlane.xlu0 %324 }
  0xeb   :  { %v484_v6 = vsel %vm483_vm14, %v482_v58, %v325_v10 }
  0xee   :  { %v436_v59 = vpop.xlane.xlu1 %435 }
  0xef   :  { %v417_v8 = vpop.xlane.xlu0 %416 }
  0xf0   :  { %v486_v9 = vsel %vm485_vm15, %v484_v6, %v417_v8 }
  0xf1   :  { %v518_v22 = vadd.f32 %v517_v62, %v486_v9 }
  0xf2   :  { %v480_v13 = vpop.xlane.xlu1 %479 }
  0xf3   :  { %520 = vst.msk [vmem:[%s930_s2] sm:$0x3] %vm49_vm10, %v518_v22  ;;  %v495_v61 = vsel %vm485_vm15, %v494_v12, %v480_v13 }
  0xf4   :  { %v531_v14 = vadd.f32 %v565_v52, %v495_v61  ;;  %v160_v15 = vpop.xlane.xlu0 %159 }
  0xf5   :  { %v487_v17 = vsel %vm481_vm13, %v160_v15, %v252_v55 }
  0xf6   :  { %566 = vst.msk [vmem:[%s930_s2 + $0x6] sm:$0x3] %vm49_vm10, %v531_v14  ;;  %v488_v18 = vsel %vm483_vm14, %v487_v17, %v344_v57 }
  0xf7   :  { %v489_v63 = vsel %vm485_vm15, %v488_v18, %v436_v59 }
  0xf8   :  { %v523_v19 = vadd.f32 %v561_v16, %v489_v63 }
  0xfa   :  { %562 = vst.msk [vmem:[%s930_s2 + $0x2] sm:$0x3] %vm49_vm10, %v523_v19 }
  0xfb   :  { %v516_v23 = vpop.xlane.xlu0 %515 }
  0xfc   :  { %v535_v43 = vadd.f32 %v567_v21, %v516_v23 }
  0xfe   :  { %568 = vst.msk [vmem:[%s930_s2 + $0x8] sm:$0x3] %vm49_vm10, %v535_v43 }

</bundles_post_ra>
